<compile_context>
chip_gen: v7x
topology: tpu7x:2x2x1
jax: 0.10.0
libtpu: 0.0.40
codegen_flags: <defaults>
</compile_context>

<pallas_src>
import functools

import jax
import jax.numpy as jnp
from jax.experimental import pallas as pl
from jax.experimental.pallas import tpu as pltpu


def _round_up(v, m):
    return (v + m - 1) // m * m


# --------------------------------------------------------------- node phase
def _node_kernel(x_ref, adj_ref, invdeg_ref,
                 w1l_ref, w1r_ref, b1_ref,
                 w2l_ref, w2r_ref, b2_ref,
                 h2_ref):
    f32, bf16 = jnp.float32, jnp.bfloat16
    x = x_ref[...]                               # [N, F] f32
    adj = adj_ref[...]                           # [N, N] bf16 (integer counts, exact)
    inv_deg = invdeg_ref[...]                    # [N, 1] f32

    # SAGEConv 1: out = lin_l(mean_j x_j) + lin_r(x_i), then ReLU.
    xb = x.astype(bf16)
    agg1 = jnp.dot(adj, xb, preferred_element_type=f32) * inv_deg
    h1 = (jnp.dot(agg1.astype(bf16), w1l_ref[...], preferred_element_type=f32)
          + jnp.dot(xb, w1r_ref[...], preferred_element_type=f32)
          + b1_ref[...])
    h1 = jnp.maximum(h1, 0.0)

    # SAGEConv 2 + ReLU.
    h1b = h1.astype(bf16)
    agg2 = jnp.dot(adj, h1b, preferred_element_type=f32) * inv_deg
    h2 = (jnp.dot(agg2.astype(bf16), w2l_ref[...], preferred_element_type=f32)
          + jnp.dot(h1b, w2r_ref[...], preferred_element_type=f32)
          + b2_ref[...])
    h2_ref[...] = jnp.maximum(h2, 0.0)


# --------------------------------------------------------------- edge phase
def _edge_kernel(src_ref, dst_ref,                    # scalar-prefetch (SMEM)
                 h2_ref, w3a_ref, w3b_ref, b3_ref, w4_ref, b4_ref,
                 out_ref, hs_ref, hd_ref):
    f32, bf16 = jnp.float32, jnp.bfloat16
    t = pl.program_id(0)
    tile_e = out_ref.shape[0]
    base = t * tile_e

    # Row gather of h2[src] / h2[dst] for this edge tile from the resident
    # [N, H] h2 block (no dense one-hot [E, N] matmuls).
    def gather(j, carry):
        s = src_ref[base + j]
        d = dst_ref[base + j]
        hs_ref[pl.ds(j, 1), :] = h2_ref[pl.ds(s, 1), :]
        hd_ref[pl.ds(j, 1), :] = h2_ref[pl.ds(d, 1), :]
        return carry

    jax.lax.fori_loop(0, tile_e, gather, 0)

    hs = hs_ref[...].astype(bf16)
    hd = hd_ref[...].astype(bf16)
    # concat([h_src, h_dst]) @ W3 fused as split-W3 matmuls.
    m = (jnp.dot(hs, w3a_ref[...], preferred_element_type=f32)
         + jnp.dot(hd, w3b_ref[...], preferred_element_type=f32)
         + b3_ref[...])
    m = jnp.maximum(m, 0.0)
    out_ref[...] = (jnp.dot(m.astype(bf16), w4_ref[...],
                            preferred_element_type=f32) + b4_ref[...])


# ------------------------------------------------------------------ wrapper
def edge_classifier_gnn(x, edge_index, params, *, tile_e=256):
    """x: [N, F] float32, edge_index: [2, E] int32, params: dict of weights."""
    n, f = x.shape
    e = edge_index.shape[1]
    h = params["w1l"].shape[1]
    out_dim = params["w4"].shape[1]
    f32, bf16 = jnp.float32, jnp.bfloat16

    src = edge_index[0].astype(jnp.int32)
    dst = edge_index[1].astype(jnp.int32)

    # Plain-JAX glue: integer in-degree counts (exact in bf16); 1/deg in f32.
    # TODO(synk): for large N, replace the dense [N,N] count matmul with
    # in-kernel segment aggregation over scalar-prefetched edge tiles.
    counts = jnp.zeros((n, n), f32).at[dst, src].add(1.0)
    inv_deg = 1.0 / jnp.maximum(counts.sum(axis=1, keepdims=True), 1.0)
    adj = counts.astype(bf16)

    w1l = params["w1l"].astype(bf16)
    w1r = params["w1r"].astype(bf16)
    w2l = params["w2l"].astype(bf16)
    w2r = params["w2r"].astype(bf16)
    b1, b2 = params["b1"], params["b2"]

    def full_spec(arr):
        nd = arr.ndim
        return pl.BlockSpec(arr.shape, lambda *_: (0,) * nd)

    node_ops = (x, adj, inv_deg, w1l, w1r, b1, w2l, w2r, b2)
    h2 = pl.pallas_call(
        _node_kernel,
        out_shape=jax.ShapeDtypeStruct((n, h), f32),
        grid=(1,),
        in_specs=[full_spec(a) for a in node_ops],
        out_specs=pl.BlockSpec((n, h), lambda *_: (0, 0)),
        compiler_params=pltpu.CompilerParams(
            dimension_semantics=("arbitrary",)),
    )(*node_ops)

    # Edge phase: tile over E, lane-dense padded output.
    lane = 128
    out_pad = _round_up(max(out_dim, lane), lane)
    w3a = params["w3"][:h].astype(bf16)
    w3b = params["w3"][h:].astype(bf16)
    b3 = params["b3"]
    w4p = jnp.zeros((h, out_pad), f32).at[:, :out_dim].set(
        params["w4"]).astype(bf16)
    b4p = jnp.zeros((1, out_pad), f32).at[:, :out_dim].set(params["b4"])

    te = min(tile_e, _round_up(e, 8))
    e_pad = _round_up(e, te)
    src_p = jnp.zeros((e_pad,), jnp.int32).at[:e].set(src)
    dst_p = jnp.zeros((e_pad,), jnp.int32).at[:e].set(dst)

    out = pl.pallas_call(
        _edge_kernel,
        out_shape=jax.ShapeDtypeStruct((e_pad, out_pad), f32),
        grid_spec=pltpu.PrefetchScalarGridSpec(
            num_scalar_prefetch=2,
            grid=(e_pad // te,),
            in_specs=[
                pl.BlockSpec((n, h), lambda i, *_: (0, 0)),        # h2 resident
                pl.BlockSpec((h, h), lambda i, *_: (0, 0)),        # w3a
                pl.BlockSpec((h, h), lambda i, *_: (0, 0)),        # w3b
                pl.BlockSpec((1, h), lambda i, *_: (0, 0)),        # b3
                pl.BlockSpec((h, out_pad), lambda i, *_: (0, 0)),  # w4 padded
                pl.BlockSpec((1, out_pad), lambda i, *_: (0, 0)),  # b4 padded
            ],
            out_specs=pl.BlockSpec((te, out_pad), lambda i, *_: (i, 0)),
            scratch_shapes=[pltpu.VMEM((te, h), f32),
                            pltpu.VMEM((te, h), f32)],
        ),
        compiler_params=pltpu.CompilerParams(
            dimension_semantics=("parallel",)),
    )(src_p, dst_p, h2, w3a, w3b, b3, w4p, b4p)
    return out[:e, :out_dim]


# -------------------------------------------------------------------- init
def init_params(key, in_dim, hidden_dim, out_dim):
    """Deterministic init (PyTorch-Linear-style uniform bounds)."""
    def lin(key, fan_in, fan_out, bias):
        kw, kb = jax.random.split(key)
        bound = 1.0 / jnp.sqrt(jnp.float32(fan_in))
        w = jax.random.uniform(kw, (fan_in, fan_out), jnp.float32, -bound, bound)
        if bias:
            b = jax.random.uniform(kb, (1, fan_out), jnp.float32, -bound, bound)
            return w, b
        return w, None

    keys = jax.random.split(key, 6)
    w1l, b1 = lin(keys[0], in_dim, hidden_dim, True)          # SAGEConv1 lin_l
    w1r, _ = lin(keys[1], in_dim, hidden_dim, False)          # SAGEConv1 lin_r
    w2l, b2 = lin(keys[2], hidden_dim, hidden_dim, True)      # SAGEConv2 lin_l
    w2r, _ = lin(keys[3], hidden_dim, hidden_dim, False)      # SAGEConv2 lin_r
    w3, b3 = lin(keys[4], 2 * hidden_dim, hidden_dim, True)   # edge MLP layer 1
    w4, b4 = lin(keys[5], hidden_dim, out_dim, True)          # edge MLP layer 2
    return {"w1l": w1l, "w1r": w1r, "b1": b1,
            "w2l": w2l, "w2r": w2r, "b2": b2,
            "w3": w3, "b3": b3, "w4": w4, "b4": b4}


def reference_forward(x, edge_index, params):
    """Pure-JAX f32 reference of the PyTorch forward."""
    hp = functools.partial(jnp.dot, precision=jax.lax.Precision.HIGHEST)
    n = x.shape[0]
    src, dst = edge_index[0], edge_index[1]

    def sage(feat, wl, wr, b):
        summed = jnp.zeros((n, feat.shape[1]), jnp.float32).at[dst].add(feat[src])
        deg = jnp.maximum(jnp.zeros((n, 1), jnp.float32).at[dst].add(1.0), 1.0)
        return hp(summed / deg, wl) + b + hp(feat, wr)

    h = jax.nn.relu(sage(x, params["w1l"], params["w1r"], params["b1"]))
    h = jax.nn.relu(sage(h, params["w2l"], params["w2r"], params["b2"]))
    edge_rep = jnp.concatenate([h[src], h[dst]], axis=1)
    m = jax.nn.relu(hp(edge_rep, params["w3"]) + params["b3"])
    return hp(m, params["w4"]) + params["b4"]


if __name__ == "__main__":
    IN_DIM, HIDDEN, OUT_DIM = 8, 32, 2
    N_NODES, N_EDGES = 16, 32

    key = jax.random.PRNGKey(0)
    k_x, k_e, k_p = jax.random.split(key, 3)

    x = jax.random.normal(k_x, (N_NODES, IN_DIM), jnp.float32)
    edge_index = jax.random.randint(k_e, (2, N_EDGES), 0, N_NODES, jnp.int32)
    params = init_params(k_p, IN_DIM, HIDDEN, OUT_DIM)

    out = jax.block_until_ready(edge_classifier_gnn(x, edge_index, params))
    ref = jax.block_until_ready(reference_forward(x, edge_index, params))

    assert out.shape == (N_EDGES, OUT_DIM), out.shape
    # bf16 MXU inputs with f32 accumulation vs. f32 HIGHEST reference.
    assert jnp.allclose(out, ref, rtol=5e-2, atol=5e-2), (
        float(jnp.max(jnp.abs(out - ref))))

    print("KERNEL_OK")
</pallas_src>

<mosaic_0001>
module attributes {stable_mosaic.version = 11 : i64} {
  func.func @_node_kernel(%arg0: i32, %arg1: memref<16x8xf32, #tpu.memory_space<vmem>>, %arg2: memref<16x16xbf16, #tpu.memory_space<vmem>>, %arg3: memref<16x1xf32, #tpu.memory_space<vmem>>, %arg4: memref<8x32xbf16, #tpu.memory_space<vmem>>, %arg5: memref<8x32xbf16, #tpu.memory_space<vmem>>, %arg6: memref<1x32xf32, #tpu.memory_space<vmem>>, %arg7: memref<32x32xbf16, #tpu.memory_space<vmem>>, %arg8: memref<32x32xbf16, #tpu.memory_space<vmem>>, %arg9: memref<1x32xf32, #tpu.memory_space<vmem>>, %arg10: memref<16x32xf32, #tpu.memory_space<vmem>>) attributes {dimension_semantics = [#tpu.dimension_semantics<arbitrary>], iteration_bounds = array<i64: 1>, scalar_prefetch = 0 : i64, scratch_operands = 0 : i64, tpu.core_type = #tpu.core_type<tc>, window_params = [{pipeline_mode = #tpu.pipeline_mode<synchronous>, transform_indices = @transform_0, window_bounds = array<i64: 16, 8>}, {pipeline_mode = #tpu.pipeline_mode<synchronous>, transform_indices = @transform_1, window_bounds = array<i64: 16, 16>}, {pipeline_mode = #tpu.pipeline_mode<synchronous>, transform_indices = @transform_2, window_bounds = array<i64: 16, 1>}, {pipeline_mode = #tpu.pipeline_mode<synchronous>, transform_indices = @transform_3, window_bounds = array<i64: 8, 32>}, {pipeline_mode = #tpu.pipeline_mode<synchronous>, transform_indices = @transform_4, window_bounds = array<i64: 8, 32>}, {pipeline_mode = #tpu.pipeline_mode<synchronous>, transform_indices = @transform_5, window_bounds = array<i64: 1, 32>}, {pipeline_mode = #tpu.pipeline_mode<synchronous>, transform_indices = @transform_6, window_bounds = array<i64: 32, 32>}, {pipeline_mode = #tpu.pipeline_mode<synchronous>, transform_indices = @transform_7, window_bounds = array<i64: 32, 32>}, {pipeline_mode = #tpu.pipeline_mode<synchronous>, transform_indices = @transform_8, window_bounds = array<i64: 1, 32>}, {pipeline_mode = #tpu.pipeline_mode<synchronous>, transform_indices = @transform_9, window_bounds = array<i64: 16, 32>}]} {
    %c0 = arith.constant 0 : index
    %c0_0 = arith.constant 0 : index
    %0 = vector.load %arg1[%c0, %c0_0] : memref<16x8xf32, #tpu.memory_space<vmem>>, vector<16x8xf32>
    %c0_1 = arith.constant 0 : index
    %c0_2 = arith.constant 0 : index
    %1 = vector.load %arg2[%c0_1, %c0_2] : memref<16x16xbf16, #tpu.memory_space<vmem>>, vector<16x16xbf16>
    %c0_3 = arith.constant 0 : index
    %c0_4 = arith.constant 0 : index
    %2 = vector.load %arg3[%c0_3, %c0_4] : memref<16x1xf32, #tpu.memory_space<vmem>>, vector<16x1xf32>
    %3 = arith.truncf %0 : vector<16x8xf32> to vector<16x8xbf16>
    %cst = arith.constant dense<0.000000e+00> : vector<16x8xf32>
    %4 = tpu.matmul %1, %3, %cst {dimension_numbers = #tpu.dot_dimension_numbers<[1], [0], [0], [1], [0, 0, 1, 1], [], []>} : vector<16x16xbf16>, vector<16x8xbf16>, vector<16x8xf32> -> vector<16x8xf32>
    %5 = vector.broadcast %2 : vector<16x1xf32> to vector<16x8xf32>
    %6 = arith.mulf %4, %5 : vector<16x8xf32>
    %7 = arith.truncf %6 : vector<16x8xf32> to vector<16x8xbf16>
    %c0_5 = arith.constant 0 : index
    %c0_6 = arith.constant 0 : index
    %8 = vector.load %arg4[%c0_5, %c0_6] : memref<8x32xbf16, #tpu.memory_space<vmem>>, vector<8x32xbf16>
    %cst_7 = arith.constant dense<0.000000e+00> : vector<16x32xf32>
    %9 = tpu.matmul %7, %8, %cst_7 {dimension_numbers = #tpu.dot_dimension_numbers<[1], [0], [0], [1], [0, 0, 1, 1], [], []>} : vector<16x8xbf16>, vector<8x32xbf16>, vector<16x32xf32> -> vector<16x32xf32>
    %c0_8 = arith.constant 0 : index
    %c0_9 = arith.constant 0 : index
    %10 = vector.load %arg5[%c0_8, %c0_9] : memref<8x32xbf16, #tpu.memory_space<vmem>>, vector<8x32xbf16>
    %cst_10 = arith.constant dense<0.000000e+00> : vector<16x32xf32>
    %11 = tpu.matmul %3, %10, %cst_10 {dimension_numbers = #tpu.dot_dimension_numbers<[1], [0], [0], [1], [0, 0, 1, 1], [], []>} : vector<16x8xbf16>, vector<8x32xbf16>, vector<16x32xf32> -> vector<16x32xf32>
    %12 = arith.addf %9, %11 : vector<16x32xf32>
    %c0_11 = arith.constant 0 : index
    %c0_12 = arith.constant 0 : index
    %13 = vector.load %arg6[%c0_11, %c0_12] : memref<1x32xf32, #tpu.memory_space<vmem>>, vector<1x32xf32>
    %14 = vector.broadcast %13 : vector<1x32xf32> to vector<16x32xf32>
    %15 = arith.addf %12, %14 : vector<16x32xf32>
    %cst_13 = arith.constant 0.000000e+00 : f32
    %16 = vector.broadcast %cst_13 : f32 to vector<16x32xf32>
    %17 = arith.maximumf %15, %16 : vector<16x32xf32>
    %18 = arith.truncf %17 : vector<16x32xf32> to vector<16x32xbf16>
    %cst_14 = arith.constant dense<0.000000e+00> : vector<16x32xf32>
    %19 = tpu.matmul %1, %18, %cst_14 {dimension_numbers = #tpu.dot_dimension_numbers<[1], [0], [0], [1], [0, 0, 1, 1], [], []>} : vector<16x16xbf16>, vector<16x32xbf16>, vector<16x32xf32> -> vector<16x32xf32>
    %20 = vector.broadcast %2 : vector<16x1xf32> to vector<16x32xf32>
    %21 = arith.mulf %19, %20 : vector<16x32xf32>
    %22 = arith.truncf %21 : vector<16x32xf32> to vector<16x32xbf16>
    %c0_15 = arith.constant 0 : index
    %c0_16 = arith.constant 0 : index
    %23 = vector.load %arg7[%c0_15, %c0_16] : memref<32x32xbf16, #tpu.memory_space<vmem>>, vector<32x32xbf16>
    %cst_17 = arith.constant dense<0.000000e+00> : vector<16x32xf32>
    %24 = tpu.matmul %22, %23, %cst_17 {dimension_numbers = #tpu.dot_dimension_numbers<[1], [0], [0], [1], [0, 0, 1, 1], [], []>} : vector<16x32xbf16>, vector<32x32xbf16>, vector<16x32xf32> -> vector<16x32xf32>
    %c0_18 = arith.constant 0 : index
    %c0_19 = arith.constant 0 : index
    %25 = vector.load %arg8[%c0_18, %c0_19] : memref<32x32xbf16, #tpu.memory_space<vmem>>, vector<32x32xbf16>
    %cst_20 = arith.constant dense<0.000000e+00> : vector<16x32xf32>
    %26 = tpu.matmul %18, %25, %cst_20 {dimension_numbers = #tpu.dot_dimension_numbers<[1], [0], [0], [1], [0, 0, 1, 1], [], []>} : vector<16x32xbf16>, vector<32x32xbf16>, vector<16x32xf32> -> vector<16x32xf32>
    %27 = arith.addf %24, %26 : vector<16x32xf32>
    %c0_21 = arith.constant 0 : index
    %c0_22 = arith.constant 0 : index
    %28 = vector.load %arg9[%c0_21, %c0_22] : memref<1x32xf32, #tpu.memory_space<vmem>>, vector<1x32xf32>
    %29 = vector.broadcast %28 : vector<1x32xf32> to vector<16x32xf32>
    %30 = arith.addf %27, %29 : vector<16x32xf32>
    %cst_23 = arith.constant 0.000000e+00 : f32
    %31 = vector.broadcast %cst_23 : f32 to vector<16x32xf32>
    %32 = arith.maximumf %30, %31 : vector<16x32xf32>
    %c0_24 = arith.constant 0 : index
    %c0_25 = arith.constant 0 : index
    %33 = vector.load %arg10[%c0_24, %c0_25] : memref<16x32xf32, #tpu.memory_space<vmem>>, vector<16x32xf32>
    tpu.vector_store %arg10[%c0_24, %c0_25], %32 {strides = array<i32>} : memref<16x32xf32, #tpu.memory_space<vmem>>, vector<16x32xf32>,
    return
  }
  func.func @transform_0(%arg0: i32) -> (i32, i32) {
    %c0_i32 = arith.constant 0 : i32
    %c0_i32_0 = arith.constant 0 : i32
    %c0_i32_1 = arith.constant 0 : i32
    return %c0_i32, %c0_i32_0 : i32, i32
  }
  func.func @transform_1(%arg0: i32) -> (i32, i32) {
    %c0_i32 = arith.constant 0 : i32
    %c0_i32_0 = arith.constant 0 : i32
    %c0_i32_1 = arith.constant 0 : i32
    return %c0_i32, %c0_i32_0 : i32, i32
  }
  func.func @transform_2(%arg0: i32) -> (i32, i32) {
    %c0_i32 = arith.constant 0 : i32
    %c0_i32_0 = arith.constant 0 : i32
    %c0_i32_1 = arith.constant 0 : i32
    return %c0_i32, %c0_i32_0 : i32, i32
  }
  func.func @transform_3(%arg0: i32) -> (i32, i32) {
    %c0_i32 = arith.constant 0 : i32
    %c0_i32_0 = arith.constant 0 : i32
    %c0_i32_1 = arith.constant 0 : i32
    return %c0_i32, %c0_i32_0 : i32, i32
  }
  func.func @transform_4(%arg0: i32) -> (i32, i32) {
    %c0_i32 = arith.constant 0 : i32
    %c0_i32_0 = arith.constant 0 : i32
    %c0_i32_1 = arith.constant 0 : i32
    return %c0_i32, %c0_i32_0 : i32, i32
  }
  func.func @transform_5(%arg0: i32) -> (i32, i32) {
    %c0_i32 = arith.constant 0 : i32
    %c0_i32_0 = arith.constant 0 : i32
    %c0_i32_1 = arith.constant 0 : i32
    return %c0_i32, %c0_i32_0 : i32, i32
  }
  func.func @transform_6(%arg0: i32) -> (i32, i32) {
    %c0_i32 = arith.constant 0 : i32
    %c0_i32_0 = arith.constant 0 : i32
    %c0_i32_1 = arith.constant 0 : i32
    return %c0_i32, %c0_i32_0 : i32, i32
  }
  func.func @transform_7(%arg0: i32) -> (i32, i32) {
    %c0_i32 = arith.constant 0 : i32
    %c0_i32_0 = arith.constant 0 : i32
    %c0_i32_1 = arith.constant 0 : i32
    return %c0_i32, %c0_i32_0 : i32, i32
  }
  func.func @transform_8(%arg0: i32) -> (i32, i32) {
    %c0_i32 = arith.constant 0 : i32
    %c0_i32_0 = arith.constant 0 : i32
    %c0_i32_1 = arith.constant 0 : i32
    return %c0_i32, %c0_i32_0 : i32, i32
  }
  func.func @transform_9(%arg0: i32) -> (i32, i32) {
    %c0_i32 = arith.constant 0 : i32
    %c0_i32_0 = arith.constant 0 : i32
    %c0_i32_1 = arith.constant 0 : i32
    return %c0_i32, %c0_i32_0 : i32, i32
  }
}

</mosaic_0001>

<bundles_post_ra>
// kernel: tpu_custom_call.1
= control target key start
LH: loop header
LB: loop body
LE: loop exit
PB: predicated region body
PF: predicated region fallthrough
CT: control target
= control target key end

     0   :  { %v511_v2 = vmov 0.0   ;;  %vm512_vm0 = vmmov 0   ;;  %vm46_vm1 = vcmask 130048   ;;  %v513_v6 = vmov 0   ;;  %s648_s0 = inlined_call_operand.vmem [shape: f32[16,8], index: 0, kind: input, shape index: {}]   ;;  %s649_s1 = inlined_call_operand.vmem [shape: bf16[16,16], index: 1, kind: input, shape index: {}]   ;;  %s650_s2 = inlined_call_operand.vmem [shape: f32[16,1], index: 2, kind: input, shape index: {}]   ;;  %s651_s3 = inlined_call_operand.vmem [shape: bf16[8,32], index: 3, kind: input, shape index: {}]   ;;  %s652_s4 = inlined_call_operand.vmem [shape: bf16[8,32], index: 4, kind: input, shape index: {}]   ;;  %s653_s5 = inlined_call_operand.vmem [shape: f32[1,32], index: 5, kind: input, shape index: {}]   ;;  %s654_s6 = inlined_call_operand.vmem [shape: bf16[32,32], index: 6, kind: input, shape index: {}]   ;;  %s655_s7 = inlined_call_operand.vmem [shape: bf16[32,32], index: 7, kind: input, shape index: {}]   ;;  %s656_s8 = inlined_call_operand.vmem [shape: f32[1,32], index: 8, kind: input, shape index: {}]   ;;  %s657_s9 = inlined_call_operand.hbm [shape: f32[16,32], index: 9, kind: output, shape index: {}]  }
   0x1   :  { %v34_v0 = vld [vmem:[%s648_s0] sm:$0xff]  ;;  %v35_v1 = vld [vmem:[%s648_s0 + $0x8] sm:$0xff]  ;;  %435 = vmatprep.subr.bf16.mxu0 %v511_v2  ;;  %437 = vmatprep.mubr.msk.bf16.mxu0 %vm512_vm0, %v511_v2 }
   0x2   :  { %v40_v3 = vpack.c.bf16 %v35_v1, %v34_v0  ;;  %v579_v4 = vld [vmem:[%s649_s1] sm:$0xff]   ;;  %481 = vset.pattern.permute.xlu0 %v513_v6  ;;  %v39_v7 = vld [vmem:[%s650_s2 + $0x8] sm:$0xff]  ;;  %441 = vmatprep.subr.bf16.mxu1 %v511_v2 }
   0x3   :  { %v38_v5 = vld [vmem:[%s650_s2] sm:$0xff]  ;;  %443 = vmatprep.mubr.msk.bf16.mxu1 %vm512_vm0, %v511_v2 }
   0x4   :  { %436 = vmatpush3.bf16.msra.mxu0 %v40_v3  ;;  %93 = vperm.xlu0 %481, %v38_v5  }
   0x5   :  { %447 = vmatprep.subr.bf16.mxu0 %v511_v2 }
   0x6   :  { %14 = vsyncpa [#allocation3], 0  ;;  %v105_v8 = vld [vmem:[%s652_s4] sm:$0xf]  ;;  %vm110_vm2 = vcmask 1043456   ;;  %vm106_vm3 = vcmask 64512  }
   0x7   :  { %438 = vmatmul.mubr.msk.bf16.vlgmr.msra.gmra.mrb[0].mxu0 %vm46_vm1, %v579_v4  ;;  %v112_v9 = vsel %vm110_vm2, %v105_v8, 0  ;;  %v104_v10 = vld [vmem:[%s651_s3] sm:$0xf]  ;;  %v484_v26 = vld [vmem:[%s655_s7 + $0x8] sm:$0xff]   ;;  %vm278_vm4 = vcmask 261120  }
   0x8   :  { %98 = vperm.xlu0 %481, %v39_v7   ;;  %449 = vmatprep.mubr.msk.bf16.mxu0 %vm512_vm0, %v511_v2  ;;  %v159_v11 = vsel %vm110_vm2, %v104_v10, 0  ;;  %v483_v25 = vld [vmem:[%s655_s7] sm:$0xff]   ;;  %v486_v40 = vld [vmem:[%s654_s6 + $0x8] sm:$0xff]  }
   0x9   :  { %442 = vmatpush3.bf16.msra.mxu1 %v112_v9  ;;  %448 = vmatpush3.bf16.msra.mxu0 %v159_v11  ;;  %v412_v28 = vld [vmem:[%s653_s5] ss:$0 sm:$0xff] }
   0xa   :  { %453 = vmatprep.subr.bf16.mxu1 %v511_v2  ;;  %459 = vmatprep.subr.bf16.mxu0 %v511_v2  ;;  %v485_v39 = vld [vmem:[%s654_s6] sm:$0xff]   ;;  %s514_s6 = smov [#allocation2]  }
   0xb   :  { %v420_v53 = vld [vmem:[%s656_s8] ss:$0 sm:$0xff]  ;;  %s397_s28 = sshll.u32 %s514_s6, 4  ;;  %s398_s28 = int_to_ptr.vmem [resolvable:$true] %s397_s28 }
   0xc   :  { %444 = vmatmul.mubr.msk.bf16.vlgmr.msra.gmra.mrb[0].mxu1 %vm106_vm3, %v40_v3  ;;  %s487_s29 = scalar_lea.vmem %s398_s28, 256  ;;  %p492_p1 = scmp.lt.s32.totalorder %s398_s28, %s398_s28 }
   0xd   :  { %455 = vmatprep.mubr.msk.bf16.mxu1 %vm512_vm0, %v511_v2  ;;  %p488_p0 = scmp.ne.s32.totalorder %s398_s28, %s487_s29  ;;  %p493_p2 = scmp.lt.s32.totalorder %s487_s29, %s487_s29 }
   0xf   :  { %p494_p3 = por %p493_p2, %p492_p1 }
  0x11   :  { %p495_p4 = pnand %p494_p3, %p488_p0 }
  0x83   :  { %v94_v12 = vpop.permute.xlu0 %93 }
  0x87   :  { %v99_v15 = vpop.permute.xlu0 %98 }
  0xda   :  { %v84_v13 = vpop.f32.mrb[0].mxu0 }
  0xdb   :  { %v439_v14 = vpop.f32.mrb[1].mxu0  ;;  %v101_v17 = vmul.f32 %v94_v12, %v84_v13 }
  0xdc   :  { %v87_v16 = vpop.f32.mrb[2].mxu0 }
  0xdd   :  { %v102_v18 = vmul.f32 %v99_v15, %v87_v16  ;;  %v440_v19 = vpop.f32.mrb[3].mxu0 }
  0xdf   :  { %v103_v20 = vpack.c.bf16 %v102_v18, %v101_v17  ;;  %v148_v21 = vpop.f32.mrb[0].mxu1 }
  0xe0   :  { %v445_v22 = vpop.f32.mrb[1].mxu1 }
  0xe1   :  { %450 = vmatmul.mubr.msk.bf16.vlgmr.msra.gmra.mrb[4].mxu0 %vm106_vm3, %v103_v20  ;;  %v151_v23 = vpop.f32.mrb[2].mxu1 }
  0xe2   :  { %463 = vmatprep.mubr.msk.bf16.mxu0 %vm512_vm0, %v511_v2  ;;  %v446_v24 = vpop.f32.mrb[3].mxu1  ;;  %460 = vmatpush3.bf16.msra.mxu0 %v483_v25 }
  0xe3   :  { %461 = vmatprep.subr.bf16.mxu0 %v511_v2 }
  0xe6   :  { %462 = vmatpush3.bf16.msra.mxu0 %v484_v26 }
 0x1b4   :  { %v195_v27 = vpop.f32.mrb[4].mxu0 }
 0x1b5   :  { %v196_v29 = vadd.f32 %v195_v27, %v148_v21  ;;  %v451_v30 = vpop.f32.mrb[5].mxu0 }
 0x1b6   :  { %v198_v31 = vpop.f32.mrb[6].mxu0 }
 0x1b7   :  { %v209_v32 = vadd.f32 %v412_v28, %v196_v29  ;;  %v199_v33 = vadd.f32 %v198_v31, %v151_v23  ;;  %v452_v34 = vpop.f32.mrb[7].mxu0 }
 0x1b9   :  { %v210_v35 = vadd.f32 %v412_v28, %v199_v33  ;;  %v211_v36 = vmax.f32 %v209_v32, 0.0 }
 0x1bb   :  { %v212_v37 = vmax.f32 %v210_v35, 0.0 }
 0x1bd   :  { %v213_v38 = vpack.c.bf16 %v212_v37, %v211_v36 }
 0x1bf   :  { %454 = vmatpush3.bf16.msra.mxu1 %v213_v38  ;;  %464 = vmatmul.mubr.msk.bf16.vlgmr.msra.gmra.mrb[8].mxu0 %vm278_vm4, %v213_v38 }
 0x1c0   :  { %467 = vmatprep.subr.bf16.mxu1 %v511_v2 }
 0x1c2   :  { %456 = vmatmul.mubr.msk.bf16.vlgmr.msra.gmra.mrb[4].mxu1 %vm46_vm1, %v579_v4 }
 0x1c3   :  { %471 = vmatprep.mubr.msk.bf16.mxu1 %vm512_vm0, %v511_v2  ;;  %468 = vmatpush3.bf16.msra.mxu1 %v485_v39 }
 0x1c4   :  { %469 = vmatprep.subr.bf16.mxu1 %v511_v2 }
 0x1c7   :  { %470 = vmatpush3.bf16.msra.mxu1 %v486_v40 }
 0x292   :  { %v316_v41 = vpop.f32.mrb[8].mxu0 }
 0x293   :  { %v465_v42 = vpop.f32.mrb[9].mxu0 }
 0x294   :  { %v319_v43 = vpop.f32.mrb[10].mxu0 }
 0x295   :  { %v248_v44 = vpop.f32.mrb[4].mxu1  ;;  %v466_v45 = vpop.f32.mrb[11].mxu0 }
 0x296   :  { %v457_v46 = vpop.f32.mrb[5].mxu1  ;;  %v255_v48 = vmul.f32 %v248_v44, %v94_v12 }
 0x297   :  { %v251_v47 = vpop.f32.mrb[6].mxu1 }
 0x298   :  { %v256_v49 = vmul.f32 %v251_v47, %v99_v15  ;;  %v458_v50 = vpop.f32.mrb[7].mxu1 }
 0x29a   :  { %v257_v51 = vpack.c.bf16 %v256_v49, %v255_v48 }
 0x29c   :  { %472 = vmatmul.mubr.msk.bf16.vlgmr.msra.gmra.mrb[8].mxu1 %vm278_vm4, %v257_v51 }
 0x36f   :  { %v372_v52 = vpop.f32.mrb[8].mxu1 }
 0x370   :  { %v373_v54 = vadd.f32 %v372_v52, %v316_v41  ;;  %v473_v55 = vpop.f32.mrb[9].mxu1 }
 0x371   :  { %v375_v56 = vpop.f32.mrb[10].mxu1 }
 0x372   :  { %v386_v57 = vadd.f32 %v420_v53, %v373_v54  ;;  %v376_v58 = vadd.f32 %v375_v56, %v319_v43  ;;  %v474_v59 = vpop.f32.mrb[11].mxu1 }
 0x374   :  { %v388_v60 = vmax.f32 %v386_v57, 0.0  ;;  %v387_v61 = vadd.f32 %v420_v53, %v376_v58 }
 0x376   :  { %390 = vst.msk [vmem:[#allocation2] sm:$0xff] %vm278_vm4, %v388_v60  ;;  %v389_v62 = vmax.f32 %v387_v61, 0.0 }
 0x378   :  { %391 = vst.msk [vmem:[#allocation2 + $0x8] sm:$0xff] %vm278_vm4, %v389_v62 }
 0x379   :  { %498 = shalt.err (!%p495_p4)
}
 0x37a   :  { %s499_s10 = scalar_lea.hbm %s657_s9, 256 }
 0x37b   :  { %p500_p5 = scmp.ne.s32.totalorder %s657_s9, %s499_s10  ;;  %p503_p6 = scmp.lt.u32.totalorder %s499_s10, %s657_s9 }
 0x37d   :  { %p505_p7 = pnand %p503_p6, %p500_p5 }
 0x37f   :  { %508 = shalt.err (!%p505_p7)
}
 0x380   :  { %s515_s15 = smov 128   ;;  %s516_s16 = smov 8  }
 0x381   :  { %403 = dma.vmem_to_hbm [thread:$0]  %s398_s28, 256, %s657_s9, [#allocation3], %s515_s15, %s515_s15, %s516_s16  }
 0x382   :  { %509 = dma.done.wait [#allocation3], 256  }
 0x383   :  { %510 = vsyncadd [#allocation3], 4294967040 }
 0x384   :  { %407 = vsyncpa [#allocation3], 1 }

</bundles_post_ra>
